<compile_context>
chip_gen: v6e
topology: v6e:2x2x1
jax: 0.10.0
libtpu: 0.0.40
codegen_flags: <defaults>
</compile_context>

<pallas_src>
import functools

import jax
import jax.numpy as jnp
from jax import lax
from jax.experimental import pallas as pl
from jax.experimental.pallas import tpu as pltpu


def _pretrain_head_kernel(x_ref, w_ref, b_ref, o_ref, *, nvars):
    # x_ref: [nvars, d_model, tile_np]   (native layout: d_model on sublanes, patch on lanes)
    # w_ref: [d_model, patch_len]        (= weight.T, contraction dim on sublanes)
    # b_ref: [1, patch_len]
    # o_ref: [tile_np, nvars * patch_len] (already in the final permuted HBM layout)
    w = w_ref[...]
    b = b_ref[...]
    cols = []
    for v in range(nvars):  # nvars is small & static -> unrolled tiny matmuls
        # Contract d_model (sublane axis of both operands): x[v].T @ W.T
        acc = lax.dot_general(
            x_ref[v], w,
            dimension_numbers=(((0,), (0,)), ((), ())),
            preferred_element_type=jnp.float32,
        )  # [tile_np, patch_len], f32
        cols.append(acc + b)
    # Lane-axis concat -> lane-dense [tile_np, nvars*patch_len] slab, single unmasked-ish store.
    out = jnp.concatenate(cols, axis=-1)
    o_ref[...] = out.astype(o_ref.dtype)


def _pick_patch_tile(num_patch):
    # Input block's minor dim (num_patch) must be a multiple of 128 or the full dim.
    if num_patch % 128 == 0:
        for cand in (512, 256, 128):
            if num_patch % cand == 0:
                return cand
    return num_patch


def pretrain_head_forward(x, weight, bias):
    """x: [bs, nvars, d_model, num_patch]
       weight: [patch_len, d_model]   (PyTorch nn.Linear convention)
       bias:   [patch_len]
       returns: [bs, num_patch, nvars, patch_len]
    """
    bs, nvars, d_model, num_patch = x.shape
    patch_len = weight.shape[0]

    # Tiny one-time layout ops on the parameters (a few KiB, negligible).
    w_t = weight.T.astype(x.dtype)                     # [d_model, patch_len]
    b2d = bias.reshape(1, patch_len).astype(jnp.float32)

    tile_np = _pick_patch_tile(num_patch)
    grid = (bs, num_patch // tile_np)

    flops = 2 * bs * nvars * num_patch * d_model * patch_len
    bytes_accessed = 4 * (bs * nvars * d_model * num_patch
                          + d_model * patch_len + patch_len
                          + bs * num_patch * nvars * patch_len)

    kernel = functools.partial(_pretrain_head_kernel, nvars=nvars)

    out_flat = pl.pallas_call(
        kernel,
        out_shape=jax.ShapeDtypeStruct((bs, num_patch, nvars * patch_len), x.dtype),
        grid=grid,
        in_specs=[
            # activation: one (batch, patch-tile) block in native layout, bs dim squeezed
            pl.BlockSpec((None, nvars, d_model, tile_np), lambda b, n: (b, 0, 0, n)),
            # weight / bias: full blocks, resident across all grid steps
            pl.BlockSpec((d_model, patch_len), lambda b, n: (0, 0)),
            pl.BlockSpec((1, patch_len), lambda b, n: (0, 0)),
        ],
        out_specs=pl.BlockSpec((None, tile_np, nvars * patch_len),
                               lambda b, n: (b, n, 0)),
        compiler_params=pltpu.CompilerParams(
            dimension_semantics=("parallel", "parallel")),
        cost_estimate=pl.CostEstimate(flops=flops, transcendentals=0,
                                      bytes_accessed=bytes_accessed),
    )(x, w_t, b2d)

    # Metadata-only split of the trailing dim: HBM layout of
    # [bs, num_patch, nvars*patch_len] is identical to [bs, num_patch, nvars, patch_len].
    return out_flat.reshape(bs, num_patch, nvars, patch_len)


if __name__ == "__main__":
    # small shapes consistent with the module
    bs, nvars, d_model, num_patch, patch_len = 2, 4, 32, 8, 16

    key = jax.random.PRNGKey(0)
    kx, kw, kb = jax.random.split(key, 3)

    x = jax.random.normal(kx, (bs, nvars, d_model, num_patch), dtype=jnp.float32)
    # deterministic nn.Linear-style params: weight [patch_len, d_model], bias [patch_len]
    bound = 1.0 / (d_model ** 0.5)
    weight = jax.random.uniform(kw, (patch_len, d_model), jnp.float32, -bound, bound)
    bias = jax.random.uniform(kb, (patch_len,), jnp.float32, -bound, bound)

    out = pretrain_head_forward(x, weight, bias)
    out = jax.block_until_ready(out)

    # reference check in plain JAX: transpose(2,3) -> linear -> permute(0,2,1,3)
    ref = jnp.einsum("bvdn,pd->bnvp", x, weight) + bias
    assert out.shape == (bs, num_patch, nvars, patch_len), out.shape
    assert jnp.allclose(out, ref, atol=1e-5, rtol=1e-5)

    print("KERNEL_OK")
</pallas_src>

<mosaic_0001>
module attributes {stable_mosaic.version = 11 : i64} {
  func.func @_pretrain_head_kernel(%arg0: i32, %arg1: i32, %arg2: memref<1x4x32x8xf32, #tpu.memory_space<vmem>>, %arg3: memref<32x16xf32, #tpu.memory_space<vmem>>, %arg4: memref<1x16xf32, #tpu.memory_space<vmem>>, %arg5: memref<1x8x64xf32, #tpu.memory_space<vmem>>) attributes {dimension_semantics = [#tpu.dimension_semantics<parallel>, #tpu.dimension_semantics<parallel>], iteration_bounds = array<i64: 2, 1>, scalar_prefetch = 0 : i64, scratch_operands = 0 : i64, tpu.core_type = #tpu.core_type<tc>, window_params = [{transform_indices = @transform_0, window_bounds = array<i64: 1, 4, 32, 8>}, {pipeline_mode = #tpu.pipeline_mode<synchronous>, transform_indices = @transform_1, window_bounds = array<i64: 32, 16>}, {pipeline_mode = #tpu.pipeline_mode<synchronous>, transform_indices = @transform_2, window_bounds = array<i64: 1, 16>}, {transform_indices = @transform_3, window_bounds = array<i64: 1, 8, 64>}]} {
    %c0 = arith.constant 0 : index
    %c0_0 = arith.constant 0 : index
    %0 = vector.load %arg3[%c0, %c0_0] : memref<32x16xf32, #tpu.memory_space<vmem>>, vector<32x16xf32>
    %c0_1 = arith.constant 0 : index
    %c0_2 = arith.constant 0 : index
    %1 = vector.load %arg4[%c0_1, %c0_2] : memref<1x16xf32, #tpu.memory_space<vmem>>, vector<1x16xf32>
    %c0_3 = arith.constant 0 : index
    %c0_4 = arith.constant 0 : index
    %c0_5 = arith.constant 0 : index
    %c0_6 = arith.constant 0 : index
    %2 = vector.load %arg2[%c0_3, %c0_4, %c0_5, %c0_6] : memref<1x4x32x8xf32, #tpu.memory_space<vmem>>, vector<1x1x32x8xf32>
    %3 = vector.shape_cast %2 : vector<1x1x32x8xf32> to vector<32x8xf32>
    %cst = arith.constant dense<0.000000e+00> : vector<8x16xf32>
    %4 = tpu.matmul %3, %0, %cst {dimension_numbers = #tpu.dot_dimension_numbers<[0], [0], [1], [1], [0, 1, 1, 1], [], []>} : vector<32x8xf32>, vector<32x16xf32>, vector<8x16xf32> -> vector<8x16xf32>
    %5 = vector.broadcast %1 : vector<1x16xf32> to vector<8x16xf32>
    %6 = arith.addf %4, %5 : vector<8x16xf32>
    %c0_7 = arith.constant 0 : index
    %c1 = arith.constant 1 : index
    %c0_8 = arith.constant 0 : index
    %c0_9 = arith.constant 0 : index
    %7 = vector.load %arg2[%c0_7, %c1, %c0_8, %c0_9] : memref<1x4x32x8xf32, #tpu.memory_space<vmem>>, vector<1x1x32x8xf32>
    %8 = vector.shape_cast %7 : vector<1x1x32x8xf32> to vector<32x8xf32>
    %cst_10 = arith.constant dense<0.000000e+00> : vector<8x16xf32>
    %9 = tpu.matmul %8, %0, %cst_10 {dimension_numbers = #tpu.dot_dimension_numbers<[0], [0], [1], [1], [0, 1, 1, 1], [], []>} : vector<32x8xf32>, vector<32x16xf32>, vector<8x16xf32> -> vector<8x16xf32>
    %10 = vector.broadcast %1 : vector<1x16xf32> to vector<8x16xf32>
    %11 = arith.addf %9, %10 : vector<8x16xf32>
    %c0_11 = arith.constant 0 : index
    %c2 = arith.constant 2 : index
    %c0_12 = arith.constant 0 : index
    %c0_13 = arith.constant 0 : index
    %12 = vector.load %arg2[%c0_11, %c2, %c0_12, %c0_13] : memref<1x4x32x8xf32, #tpu.memory_space<vmem>>, vector<1x1x32x8xf32>
    %13 = vector.shape_cast %12 : vector<1x1x32x8xf32> to vector<32x8xf32>
    %cst_14 = arith.constant dense<0.000000e+00> : vector<8x16xf32>
    %14 = tpu.matmul %13, %0, %cst_14 {dimension_numbers = #tpu.dot_dimension_numbers<[0], [0], [1], [1], [0, 1, 1, 1], [], []>} : vector<32x8xf32>, vector<32x16xf32>, vector<8x16xf32> -> vector<8x16xf32>
    %15 = vector.broadcast %1 : vector<1x16xf32> to vector<8x16xf32>
    %16 = arith.addf %14, %15 : vector<8x16xf32>
    %c0_15 = arith.constant 0 : index
    %c3 = arith.constant 3 : index
    %c0_16 = arith.constant 0 : index
    %c0_17 = arith.constant 0 : index
    %17 = vector.load %arg2[%c0_15, %c3, %c0_16, %c0_17] : memref<1x4x32x8xf32, #tpu.memory_space<vmem>>, vector<1x1x32x8xf32>
    %18 = vector.shape_cast %17 : vector<1x1x32x8xf32> to vector<32x8xf32>
    %cst_18 = arith.constant dense<0.000000e+00> : vector<8x16xf32>
    %19 = tpu.matmul %18, %0, %cst_18 {dimension_numbers = #tpu.dot_dimension_numbers<[0], [0], [1], [1], [0, 1, 1, 1], [], []>} : vector<32x8xf32>, vector<32x16xf32>, vector<8x16xf32> -> vector<8x16xf32>
    %20 = vector.broadcast %1 : vector<1x16xf32> to vector<8x16xf32>
    %21 = arith.addf %19, %20 : vector<8x16xf32>
    %22 = tpu.concatenate %6, %11, %16, %21 in 1 : vector<8x16xf32>, vector<8x16xf32>, vector<8x16xf32>, vector<8x16xf32> -> vector<8x64xf32>
    %c0_19 = arith.constant 0 : index
    %c0_20 = arith.constant 0 : index
    %c0_21 = arith.constant 0 : index
    %23 = vector.load %arg5[%c0_19, %c0_20, %c0_21] : memref<1x8x64xf32, #tpu.memory_space<vmem>>, vector<1x8x64xf32>
    %24 = vector.shape_cast %23 : vector<1x8x64xf32> to vector<8x64xf32>
    %25 = vector.shape_cast %22 : vector<8x64xf32> to vector<1x8x64xf32>
    tpu.vector_store %arg5[%c0_19, %c0_20, %c0_21], %25 {strides = array<i32>} : memref<1x8x64xf32, #tpu.memory_space<vmem>>, vector<1x8x64xf32>,
    return
  }
  func.func @transform_0(%arg0: i32, %arg1: i32) -> (i32, i32, i32, i32) {
    %c0_i32 = arith.constant 0 : i32
    %c0_i32_0 = arith.constant 0 : i32
    %c0_i32_1 = arith.constant 0 : i32
    return %arg0, %c0_i32, %c0_i32_0, %arg1 : i32, i32, i32, i32
  }
  func.func @transform_1(%arg0: i32, %arg1: i32) -> (i32, i32) {
    %c0_i32 = arith.constant 0 : i32
    %c0_i32_0 = arith.constant 0 : i32
    %c0_i32_1 = arith.constant 0 : i32
    return %c0_i32, %c0_i32_0 : i32, i32
  }
  func.func @transform_2(%arg0: i32, %arg1: i32) -> (i32, i32) {
    %c0_i32 = arith.constant 0 : i32
    %c0_i32_0 = arith.constant 0 : i32
    %c0_i32_1 = arith.constant 0 : i32
    return %c0_i32, %c0_i32_0 : i32, i32
  }
  func.func @transform_3(%arg0: i32, %arg1: i32) -> (i32, i32, i32) {
    %c0_i32 = arith.constant 0 : i32
    %c0_i32_0 = arith.constant 0 : i32
    return %arg0, %arg1, %c0_i32 : i32, i32, i32
  }
}

</mosaic_0001>

<bundles_post_ra>
// kernel: tpu_custom_call.1
= control target key start
LH: loop header
LB: loop body
LE: loop exit
PB: predicated region body
PF: predicated region fallthrough
CT: control target
= control target key end

     0   :  { %8 = vsyncpa [#allocation3], 0  ;;  %s1196_s0 = inlined_call_operand.vmem [shape: f32[2,4,32,8], index: 0, kind: input, shape index: {}]   ;;  %s1197_s1 = inlined_call_operand.vmem [shape: f32[32,16], index: 1, kind: input, shape index: {}]   ;;  %s1198_s2 = inlined_call_operand.vmem [shape: f32[1,16], index: 2, kind: input, shape index: {}]   ;;  %s1199_s3 = inlined_call_operand.hbm [shape: f32[2,8,64], index: 3, kind: output, shape index: {}]  }
   0x1   :  { %10 = vsyncpa [#allocation3 + $0x1], 0  ;;  %s1011_s12 = smov 0   ;;  %s1013_s13 = smov 0  }
   0x2   :  { %s1015_s14 = smov 0   ;;  %s1017_s15 = smov 0  }
   0x3   :  { %s1019_s16 = smov 0   ;;  %s1021_s17 = smov 0  }
   0x4 LB: > { %s753_s18 = sadd.s32 4294967295, %s983_s17   ;;  %s754_s19 = sadd.s32 4294967294, %s983_s17   ;;  %s983_s17 = sphi %s1021_s17, %s16_s17   ;;  %s979_s16 = sphi %s1019_s16, %s1206_s16   ;;  %s975_s15 = sphi %s1017_s15, %s1205_s15   ;;  %s971_s14 = sphi %s1015_s14, %s1204_s14   ;;  %s967_s13 = sphi %s1013_s13, %s1203_s13   ;;  %s963_s12 = sphi %s1011_s12, %s1202_s12  }
   0x5   : > { %s28_s20 = sadd.s32 1, %s979_s16  ;;  %s107_s21 = sadd.s32 1, %s971_s14 }
   0x6   : > { %p30_p0 = scmp.ge.s32.totalorder %s28_s20, 2  ;;  %p117_p1 = scmp.ne.s32.totalorder %s971_s14, %s967_s13 }
   0x7   : > { %p118_p2 = scmp.eq.s32.totalorder %s753_s18, 1  ;;  %p123_p3 = scmp.ne.s32.totalorder %s967_s13, %s963_s12 }
   0x8   : > { %s1208_s20 = smov (%p30_p0, %s28_s20), 0  ;;  %p124_p5 = scmp.eq.s32.totalorder %s754_s19, 1 }
   0x9   : > { %p1051_p4 = por %p118_p2, %p117_p1  ;;  %s102_s23 = ssub.s32 %s979_s16, %s1208_s20 }
   0xa   : > { %p757_p6 = scmp.ge.s32.totalorder %s983_s17, 1  ;;  %p105_p7 = scmp.eq.s32.totalorder %s102_s23, 0 }
   0xb   : > { %p1058_p8 = por %p124_p5, %p123_p3  ;;  %p159_p9 = scmp.lt.s32.totalorder %s983_s17, 3 }
   0xc   : > { %s1064_s25 = scalar_select %p105_p7, %s971_s14, %s107_s21  }
   0xd   : > { %p160_p10 = pnand %p757_p6, %p159_p9 }
   0xe   : > { %p186_p11 = scmp.lt.s32.totalorder (!%p160_p10), %s975_s15, 1  ;;  %s987_s21 = smov (!%p160_p10), 16  }
   0xf   : > { %163 = sbr.rel (%p160_p10) target bundleno = 496 (0x1f0), region = 32  ;;  %s988_s23 = smov (!%p160_p10), 32  }
  0x10   : > { %s989_s26 = smov (!%p160_p10), 48   ;;  %s183_s27 = sand.u32 (!%p160_p10), 1, %s967_s13  }
  0x11   : > { %s758_s28 = sshll.u32 (!%p160_p10), %s183_s27, 3  ;;  %s779_s29 = sshll.u32 (!%p160_p10), %s975_s15, 7 }
  0x12   : > { %s1156_s7 = scalar_lea.hbm (!%p160_p10), %s1199_s3, %s779_s29  ;;  %s665_s8 = scalar_lea.sflag (!%p160_p10), [#allocation3], %s183_s27 }
  0x14   : > { %v1070_v0 = vld [vmem:[%s1197_s1 + $0x18] sm:$0xff]  ;;  %v985_v1 = vmov 0.0   ;;  %v1076_v2 = vld [vmem:[%s1197_s1 + $0x10] sm:$0xff]  ;;  %s187_s30 = scalar_select %p186_p11, %s975_s15, 1  ;;  %vm986_vm0 = vmmov 0   ;;  %v1087_v3 = vld [vmem:[%s1197_s1 + $0x8] sm:$0xff] }
  0x15   : > { %814 = vmatprep.subr.mxu1 %v985_v1  ;;  %803 = vmatprep.subr.mxu0 %v985_v1  ;;  %v194_v6 = vld [vmem:[%s1197_s1] sm:$0xff]  ;;  %vm241_vm1 = vcmask 261120   ;;  %vm657_vm2 = vcmask 130048   ;;  %vm660_vm3 = vcmask 392192   ;;  %vm662_vm4 = vcmask 523264   ;;  %s990_s15 = smov [#allocation2]  }
  0x16   : > { %815 = vmatpush3.msra.mxu1 %v1070_v0  ;;  %822 = vmatprep.mubr.msk.f32.mxu1 %vm986_vm0, %v985_v1  ;;  %s782_s6 = sshll.u32 %s187_s30, 7  ;;  %v761_v25 = vld [vmem:[%s1198_s2] ss:$0 sm:$0xff]  ;;  %s185_s30 = scalar_lea.vmem [#allocation2], %s758_s28 }
  0x17   : > { %816 = vmatprep.subr.mxu1 %v985_v1  ;;  %804 = vmatpush3.msra.mxu0 %v1070_v0  ;;  %s1095_s9 = scalar_lea.vmem %s1196_s0, %s782_s6  ;;  %s679_s4 = sshll.u32 %s185_s30, 4  ;;  %s680_s4 = int_to_ptr.vmem [resolvable:$true] %s679_s4 }
  0x18   : > { %817 = vmatpush3.msra.mxu1 %v1076_v2  ;;  %805 = vmatprep.subr.mxu0 %v985_v1  ;;  %v763_v4 = vld [vmem:[%s1095_s9 + $0x20] sm:$0xff]  ;;  %v764_v7 = vld [vmem:[%s1095_s9 + $0x28] sm:$0xff]  ;;  %v765_v9 = vld [vmem:[%s1095_s9 + $0x30] sm:$0xff]  ;;  %s911_s10 = sshll.u32 %s990_s15, 4  ;;  %s912_s10 = int_to_ptr.vmem [resolvable:$false] %s911_s10 }
  0x19   : > { %818 = vmatprep.subr.mxu1 %v985_v1  ;;  %806 = vmatpush3.msra.mxu0 %v1076_v2  ;;  %v199_v5 = vld [vmem:[%s1095_s9] sm:$0xff]  ;;  %v200_v8 = vld [vmem:[%s1095_s9 + $0x8] sm:$0xff]  ;;  %v201_v10 = vld [vmem:[%s1095_s9 + $0x10] sm:$0xff]  ;;  %s913_s11 = scalar_lea.vmem %s912_s10, 256  ;;  %p914_p1 = scmp.lt.s32.totalorder %s680_s4, %s912_s10 }
  0x1a   : > { %819 = vmatpush3.msra.mxu1 %v1087_v3  ;;  %807 = vmatprep.subr.mxu0 %v985_v1  ;;  %v766_v11 = vld [vmem:[%s1095_s9 + $0x38] sm:$0xff]  ;;  %v768_v13 = vld [vmem:[%s1095_s9 + $0x40] sm:$0xff]  ;;  %v769_v15 = vld [vmem:[%s1095_s9 + $0x48] sm:$0xff] }
  0x1b   : > { %320 = vxpose.xlu1.b32.start [1/4] (short) (narrow) %v763_v4, 8  ;;  %209 = vxpose.xlu0.b32.start [1/4] (short) (narrow) %v199_v5, 8  ;;  %v202_v12 = vld [vmem:[%s1095_s9 + $0x18] sm:$0xff]  ;;  %v773_v14 = vld [vmem:[%s1095_s9 + $0x60] sm:$0xff]  ;;  %v774_v16 = vld [vmem:[%s1095_s9 + $0x68] sm:$0xff] }
  0x1c   : > { %820 = vmatprep.subr.mxu1 %v985_v1  ;;  %808 = vmatpush3.msra.mxu0 %v1087_v3  ;;  %v770_v17 = vld [vmem:[%s1095_s9 + $0x50] sm:$0xff]  ;;  %v771_v19 = vld [vmem:[%s1095_s9 + $0x58] sm:$0xff] }
  0x1d   : > { %821 = vmatpush3.msra.mxu1 %v194_v6  ;;  %809 = vmatprep.subr.mxu0 %v985_v1  ;;  %v775_v18 = vld [vmem:[%s1095_s9 + $0x70] sm:$0xff]  ;;  %v776_v20 = vld [vmem:[%s1095_s9 + $0x78] sm:$0xff]  ;;  %s907_s9 = scalar_lea.vmem %s680_s4, 128 }
  0x1e   : > { %810 = vmatpush3.msra.mxu0 %v194_v6  ;;  %811 = vmatprep.mubr.msk.f32.mxu0 %vm986_vm0, %v985_v1  ;;  %p908_p12 = scmp.ne.s32.totalorder %s680_s4, %s907_s9  ;;  %p915_p2 = scmp.lt.s32.totalorder %s913_s11, %s907_s9 }
  0x1f   : > { %321 = vxpose.xlu1.b32.cont [2/4] (short) (narrow) %v764_v7, 8  ;;  %210 = vxpose.xlu0.b32.cont [2/4] (short) (narrow) %v200_v8, 8 }
  0x20   : > { %825 = vmatprep.subr.mxu0 %v985_v1  ;;  %836 = vmatprep.subr.mxu1 %v985_v1  ;;  %p909_p13 = pnand %p908_p12, %p1051_p4  ;;  %p916_p3 = por %p915_p2, %p914_p1 }
  0x22   : > { %p910_p0 = pneg %p909_p13 }
  0x23   : > { %322 = vxpose.xlu1.b32.cont [3/4] (short) (narrow) %v765_v9, 8  ;;  %211 = vxpose.xlu0.b32.cont [3/4] (short) (narrow) %v201_v10, 8 }
  0x24   : > { %p917_p5 = pnand %p916_p3, %p910_p0 }
  0x27   : > { %323 = vxpose.xlu1.b32.end [4/4] (short) (narrow) %v766_v11, 8  ;;  %212 = vxpose.xlu0.b32.end [4/4] (short) (narrow) %v202_v12, 8 }
  0x2b   : > { %430 = vxpose.xlu0.b32.start [1/4] (short) (narrow) %v768_v13, 8  ;;  %540 = vxpose.xlu1.b32.start [1/4] (short) (narrow) %v773_v14, 8 }
  0x2f   : > { %431 = vxpose.xlu0.b32.cont [2/4] (short) (narrow) %v769_v15, 8  ;;  %541 = vxpose.xlu1.b32.cont [2/4] (short) (narrow) %v774_v16, 8 }
  0x33   : > { %432 = vxpose.xlu0.b32.cont [3/4] (short) (narrow) %v770_v17, 8  ;;  %542 = vxpose.xlu1.b32.cont [3/4] (short) (narrow) %v775_v18, 8 }
  0x37   : > { %433 = vxpose.xlu0.b32.end [4/4] (short) (narrow) %v771_v19, 8  ;;  %543 = vxpose.xlu1.b32.end [4/4] (short) (narrow) %v776_v20, 8 }
  0x97   : > { %v336_v21 = vpop.trf.xlu1  ;;  %v225_v22 = vpop.trf.xlu0 }
  0x98   : > { %823 = vmatmul.mubr.msk.f32.vlgmr.msra.gmra.mxu1 %vm241_vm1, %v336_v21  ;;  %812 = vmatmul.mubr.msk.f32.vlgmr.msra.gmra.mxu0 %vm241_vm1, %v225_v22 }
  0x99   : > { %826 = vmatpush3.msra.mxu0 %v1070_v0  ;;  %837 = vmatpush3.msra.mxu1 %v1070_v0 }
  0x9a   : > { %827 = vmatprep.subr.mxu0 %v985_v1  ;;  %838 = vmatprep.subr.mxu1 %v985_v1 }
  0x9b   : > { %828 = vmatpush3.msra.mxu0 %v1076_v2  ;;  %839 = vmatpush3.msra.mxu1 %v1076_v2 }
  0x9c   : > { %829 = vmatprep.subr.mxu0 %v985_v1  ;;  %840 = vmatprep.subr.mxu1 %v985_v1 }
  0x9d   : > { %830 = vmatpush3.msra.mxu0 %v1087_v3  ;;  %833 = vmatprep.mubr.msk.f32.mxu0 %vm986_vm0, %v985_v1 }
  0x9e   : > { %831 = vmatprep.subr.mxu0 %v985_v1  ;;  %841 = vmatpush3.msra.mxu1 %v1087_v3 }
  0x9f   : > { %832 = vmatpush3.msra.mxu0 %v194_v6  ;;  %842 = vmatprep.subr.mxu1 %v985_v1 }
  0xa0   : > { %843 = vmatpush3.msra.mxu1 %v194_v6  ;;  %844 = vmatprep.mubr.msk.f32.mxu1 %vm986_vm0, %v985_v1 }
  0xa7   : > { %v446_v23 = vpop.trf.xlu0  ;;  %v556_v24 = vpop.trf.xlu1 }
  0xa8   : > { %834 = vmatmul.mubr.msk.f32.vlgmr.msra.gmra.mxu0 %vm241_vm1, %v446_v23  ;;  %845 = vmatmul.mubr.msk.f32.vlgmr.msra.gmra.mxu1 %vm241_vm1, %v556_v24 }
 0x158   : > { %v421_v26 = vpop.f32.mrf.mxu1  ;;  %v311_v27 = vpop.f32.mrf.mxu0 }
 0x159   : > { %v422_v28 = vadd.f32 %v761_v25, %v421_v26  ;;  %v312_v29 = vadd.f32 %v761_v25, %v311_v27 }
 0x15a   : > { %v813_v30 = vpop.f32.mrf.mxu0  ;;  %v824_v31 = vpop.f32.mrf.mxu1 }
 0x15b   : > { %646 = vrot.lane.b32.xlu0 %v422_v28, %s987_s21 }
 0x168   : > { %v531_v32 = vpop.f32.mrf.mxu0  ;;  %v641_v33 = vpop.f32.mrf.mxu1 }
 0x169   : > { %v532_v34 = vadd.f32 %v761_v25, %v531_v32  ;;  %v642_v37 = vadd.f32 %v761_v25, %v641_v33 }
 0x16a   : > { %v835_v35 = vpop.f32.mrf.mxu0  ;;  %v846_v36 = vpop.f32.mrf.mxu1 }
 0x16b   : > { %650 = vrot.lane.b32.xlu1 %v532_v34, %s988_s23 }
 0x16f   : > { %654 = vrot.lane.b32.xlu1 %v642_v37, %s989_s26 }
 0x1cd   : > { %v647_v38 = vpop.permute.xlu0 %646 }
 0x1ce   : > { %v658_v40 = vsel %vm657_vm2, %v312_v29, %v647_v38 }
 0x1dd   : > { %v651_v39 = vpop.permute.xlu1 %650 }
 0x1de   : > { %v659_v41 = vsel %vm241_vm1, %v658_v40, %v651_v39 }
 0x1e1   : > { %v655_v42 = vpop.permute.xlu1 %654 }
 0x1e2   : > { %v661_v43 = vsel %vm660_vm3, %v659_v41, %v655_v42 }
 0x1e3   : > { %663 = vst.msk [vmem:[%s185_s30] sm:$0xff] %vm662_vm4, %v661_v43 }
 0x1e4   : > { %920 = shalt.err (!%p917_p5)
}
 0x1e5   : > { %s921_s18 = scalar_lea.hbm %s1156_s7, 128  ;;  %s925_s23 = scalar_lea.hbm %s1199_s3, 256 }
 0x1e6   : > { %p922_p6 = scmp.ne.s32.totalorder %s1156_s7, %s921_s18  ;;  %p926_p10 = scmp.lt.s32.totalorder %s1156_s7, %s1199_s3 }
 0x1e7   : > { %p927_p11 = scmp.lt.s32.totalorder %s925_s23, %s921_s18 }
 0x1e8   : > { %p923_p7 = pnand %p922_p6, %p1051_p4 }
 0x1e9   : > { %p928_p12 = por %p927_p11, %p926_p10 }
 0x1ea   : > { %p924_p9 = pneg %p923_p7 }
 0x1ec   : > { %p929_p13 = pnand %p928_p12, %p924_p9 }
 0x1ee   : > { %932 = shalt.err (!%p929_p13)
}
 0x1ef   : > { %847 = dma.vmem_to_hbm [thread:$0]  (%p1051_p4), %s680_s4, 128, %s1156_s7, %s665_s8  }
 0x1f0 PF: > { %p853_p0 = scmp.ge.s32.totalorder %s983_s17, 2  ;;  %s691_s28 = sand.u32 1, %s963_s12  }
 0x1f1   : > { %s692_s29 = scalar_lea.sflag [#allocation3], %s691_s28 }
 0x1f2   : > { %p850_p1 = pnand %p853_p0, %p1058_p8 }
 0x1f4   : > { %p851_p2 = pneg %p850_p1 }
 0x1f6   : > { %958 = dma.done.wait (%p851_p2), %s692_s29, 128  }
 0x1f7   : > { %960 = vsyncadd (%p851_p2), %s692_s29, 4294967168  ;;  %s16_s17 = sadd.s32 1, %s983_s17   ;;  %s1202_s12 = smov %s967_s13 }
 0x1f8   : > { %p13_p3 = scmp.ge.s32.totalorder %s16_s17, 4   ;;  %s1203_s13 = smov %s971_s14 }
 0x1f9   : > { %s1204_s14 = smov %s1064_s25  ;;  %s1205_s15 = smov %s979_s16 }
 0x1fa   : > { %s1206_s16 = smov %s1208_s20  ;;  %15 = sbr.rel (!%p13_p3) target bundleno = 4 (0x4), region = 70 }
 0x1ff   :  { %697 = vsyncpa [#allocation3], 1 }
 0x200   :  { %699 = vsyncpa [#allocation3 + $0x1], 1 }

</bundles_post_ra>
